<compile_context>
chip_gen: v5e
topology: v5e:2x2
jax: 0.10.0
libtpu: 0.0.40
codegen_flags: <defaults>
</compile_context>

<pallas_src>
import math

import jax
import jax.numpy as jnp
import numpy as np
from jax.experimental import pallas as pl
from jax.experimental.pallas import tpu as pltpu


def _round_up(a, m):
    return (a + m - 1) // m * m


def _cdiv(a, b):
    return (a + b - 1) // b


def _actor_observer_kernel(x_ref, y_ref, z_ref, wb_ref, bb_ref, wfp_ref,
                           wt_ref, scal_ref, out_ref,
                           acc_x, acc_y, acc_z):
    # Grid: (i = batch tile, "parallel") x (k = feature/K tile, "arbitrary").
    k = pl.program_id(1)

    @pl.when(k == 0)
    def _init():
        acc_x[...] = jnp.zeros_like(acc_x)
        acc_y[...] = jnp.zeros_like(acc_y)
        acc_z[...] = jnp.zeros_like(acc_z)

    # One shared (tk, D) bf16 weight block; three (tm, tk) @ (tk, D) MXU dots.
    # LHS tiles arrive as f32 straight from HBM; the bf16 cast is in-kernel
    # VPU work that hides under the DMA (kernel is HBM-bound at ~D flops/byte).
    wb = wb_ref[...]
    acc_x[...] += jnp.dot(x_ref[...].astype(jnp.bfloat16), wb,
                          preferred_element_type=jnp.float32)
    acc_y[...] += jnp.dot(y_ref[...].astype(jnp.bfloat16), wb,
                          preferred_element_type=jnp.float32)
    acc_z[...] += jnp.dot(z_ref[...].astype(jnp.bfloat16), wb,
                          preferred_element_type=jnp.float32)

    @pl.when(k == pl.num_programs(1) - 1)
    def _epilogue():
        bb = bb_ref[...]                      # (1, D) f32
        bx = acc_x[...] + bb                  # (tm, D)
        by = acc_y[...] + bb
        bz = acc_z[...] + bb

        # F.pairwise_distance(a, b, p=2, eps=1e-6) == ||a - b + eps||_2 per row.
        eps = 1e-6
        dist_a = jnp.sqrt(jnp.sum(jnp.square(bx - by + eps),
                                  axis=-1, keepdims=True))
        dist_b = jnp.sqrt(jnp.sum(jnp.square(by - bz + eps),
                                  axis=-1, keepdims=True))

        # SMEM scalars: [bfp, bt, exp(firstpos), exp(third), exp(firstneg)].
        bfp, bt = scal_ref[0], scal_ref[1]
        s_fp, s_t, s_fn = scal_ref[2], scal_ref[3], scal_ref[4]

        # Linear(D, 1) + Tanh as broadcast-multiply + lane reduction
        # (firstpos and firstneg share Wfp / bfp, exactly as in the module).
        wfp = wfp_ref[...]                    # (1, D)
        wt = wt_ref[...]                      # (1, D)
        w_x = jnp.tanh(jnp.sum(bx * wfp, axis=-1, keepdims=True) + bfp) * s_fp
        w_y = jnp.tanh(jnp.sum(by * wt, axis=-1, keepdims=True) + bt) * s_t
        w_z = jnp.tanh(jnp.sum(bz * wfp, axis=-1, keepdims=True) + bfp) * s_fn

        # Single full-block lane-dense store of the packed (tm, 8) result.
        tm = out_ref.shape[0]
        out_ref[...] = jnp.concatenate(
            [dist_a, dist_b, w_x, w_y, w_z, jnp.zeros((tm, 3), jnp.float32)],
            axis=-1)


def actor_observer_forward(x, y, z, params):
    """x, y, z: (B, C, H, W).  Returns (dist_a, dist_b, w_x, w_y, w_z), each (B,)."""
    B = x.shape[0]
    F = int(np.prod(x.shape[1:]))
    D = params["Wb"].shape[1]

    # ---- tiling ---------------------------------------------------------
    # Batch tile: as big as possible (amortize per-step overhead), but on v7x
    # keep >= 2 "parallel" M tiles whenever the padded batch allows (2 TCs).
    tm = min(256, _round_up(B, 16))
    m_pad = _round_up(B, tm)
    if m_pad >= 32 and m_pad // tm < 2:
        tm = _round_up(_cdiv(m_pad, 2), 16)
        m_pad = _round_up(B, tm)

    # Reduction tile: big enough to reach the HBM roofline (feedback: 2048+).
    tk = min(2048, _round_up(F, 128))
    f_pad = _round_up(F, tk)
    grid = (m_pad // tm, f_pad // tk)        # (M "parallel", K "arbitrary")

    # ---- wrapper-side prep (no materialized pack) ------------------------
    # reshape(B, F) is layout-free on contiguous NCHW; padding is only
    # applied when a dim is not tile-aligned (zero K padding keeps the dot
    # exact; padded batch rows are sliced away below).
    def prep(a):
        a = a.reshape(B, F).astype(jnp.float32)
        if m_pad != B or f_pad != F:
            a = jnp.pad(a, ((0, m_pad - B), (0, f_pad - F)))
        return a

    xf, yf, zf = prep(x), prep(y), prep(z)

    wb = params["Wb"].astype(jnp.float32)
    if f_pad != F:
        wb = jnp.pad(wb, ((0, f_pad - F), (0, 0)))
    wb = wb.astype(jnp.bfloat16)             # tiny one-time cast; halves Wb stream
    bb = params["bb"].astype(jnp.float32)
    wfp = params["Wfp"].astype(jnp.float32)
    wt = params["Wt"].astype(jnp.float32)

    # Tiny scalars -> SMEM: [bfp, bt, exp(firstpos), exp(third), exp(firstneg)]
    scal = jnp.concatenate([
        params["bfp"].reshape(-1),
        params["bt"].reshape(-1),
        jnp.exp(params["scales"]).reshape(-1),
    ]).astype(jnp.float32)

    in_specs = [
        pl.BlockSpec((tm, tk), lambda i, k: (i, k)),           # x
        pl.BlockSpec((tm, tk), lambda i, k: (i, k)),           # y
        pl.BlockSpec((tm, tk), lambda i, k: (i, k)),           # z
        pl.BlockSpec((tk, D), lambda i, k: (k, 0)),            # basenet W (bf16)
        pl.BlockSpec((1, D), lambda i, k: (0, 0)),             # basenet b
        pl.BlockSpec((1, D), lambda i, k: (0, 0)),             # firstpos fc W
        pl.BlockSpec((1, D), lambda i, k: (0, 0)),             # third fc W
        pl.BlockSpec(memory_space=pltpu.MemorySpace.SMEM),     # scalar params
    ]
    out_specs = pl.BlockSpec((tm, 8), lambda i, k: (i, 0))
    out_shape = jax.ShapeDtypeStruct((m_pad, 8), jnp.float32)

    cost = pl.CostEstimate(
        flops=2 * 3 * m_pad * f_pad * D,
        transcendentals=3 * m_pad,
        bytes_accessed=(4 * 3 * m_pad * f_pad                 # f32 LHS streams
                        + 2 * (m_pad // tm) * f_pad * D       # bf16 Wb per i tile
                        + 4 * m_pad * 8),
    )

    out = pl.pallas_call(
        _actor_observer_kernel,
        grid=grid,
        in_specs=in_specs,
        out_specs=out_specs,
        out_shape=out_shape,
        scratch_shapes=[pltpu.VMEM((tm, D), jnp.float32),
                        pltpu.VMEM((tm, D), jnp.float32),
                        pltpu.VMEM((tm, D), jnp.float32)],
        compiler_params=pltpu.CompilerParams(
            dimension_semantics=("parallel", "arbitrary"),
            vmem_limit_bytes=32 * 1024 * 1024),
        cost_estimate=cost,
    )(xf, yf, zf, wb, bb, wfp, wt, scal)

    out = out[:B]
    # .view(-1) in the torch code.
    return out[:, 0], out[:, 1], out[:, 2], out[:, 3], out[:, 4]


def _reference_forward(x, y, z, params, quantize_matmul_to_bf16=True):
    """Pure-JAX reference replicating the PyTorch semantics."""
    B = x.shape[0]
    F = int(np.prod(x.shape[1:]))
    xf, yf, zf = (a.reshape(B, F).astype(jnp.float32) for a in (x, y, z))
    wb = params["Wb"].astype(jnp.float32)
    if quantize_matmul_to_bf16:
        xf, yf, zf = (a.astype(jnp.bfloat16).astype(jnp.float32)
                      for a in (xf, yf, zf))
        wb = wb.astype(jnp.bfloat16).astype(jnp.float32)
    bx = xf @ wb + params["bb"]
    by = yf @ wb + params["bb"]
    bz = zf @ wb + params["bb"]
    eps = 1e-6
    dist_a = jnp.sqrt(jnp.sum(jnp.square(bx - by + eps), axis=-1))
    dist_b = jnp.sqrt(jnp.sum(jnp.square(by - bz + eps), axis=-1))
    es = jnp.exp(params["scales"])[0]
    w_x = jnp.tanh(jnp.sum(bx * params["Wfp"], axis=-1) + params["bfp"][0, 0]) * es[0]
    w_y = jnp.tanh(jnp.sum(by * params["Wt"], axis=-1) + params["bt"][0, 0]) * es[1]
    w_z = jnp.tanh(jnp.sum(bz * params["Wfp"], axis=-1) + params["bfp"][0, 0]) * es[2]
    return dist_a, dist_b, w_x, w_y, w_z


def make_params(key, F, D):
    k1, k2, k3, k4 = jax.random.split(key, 4)
    return {
        # synthetic basenet (Linear F -> D)
        "Wb": jax.random.normal(k1, (F, D), jnp.float32) / math.sqrt(F),
        "bb": 0.01 * jax.random.normal(k2, (1, D), jnp.float32),
        # firstpos_fc (== firstneg_fc, shared weights): Linear(D, 1)
        "Wfp": jax.random.normal(k3, (1, D), jnp.float32) / math.sqrt(D),
        "bfp": jnp.zeros((1, 1), jnp.float32),
        # third_fc: Linear(D, 1)
        "Wt": jax.random.normal(k4, (1, D), jnp.float32) / math.sqrt(D),
        "bt": jnp.zeros((1, 1), jnp.float32),
        # [firstpos_scale, third_scale, firstneg_scale] = log(0.5)
        "scales": jnp.full((1, 3), math.log(0.5), jnp.float32),
    }


if __name__ == "__main__":
    B, C, H, W = 2, 4, 16, 16
    D = 32                        # basenet.outdim
    F = C * H * W

    key = jax.random.PRNGKey(0)
    kx, ky, kz, kp = jax.random.split(key, 4)
    x = jax.random.normal(kx, (B, C, H, W), jnp.float32)
    y = jax.random.normal(ky, (B, C, H, W), jnp.float32)
    z = jax.random.normal(kz, (B, C, H, W), jnp.float32)
    params = make_params(kp, F, D)

    outs = jax.block_until_ready(actor_observer_forward(x, y, z, params))

    # Tight check against a reference with identically bf16-quantized matmul
    # operands (f32 accumulation), then a loose sanity check against pure f32.
    refs_q = _reference_forward(x, y, z, params, quantize_matmul_to_bf16=True)
    for o, r in zip(outs, refs_q):
        np.testing.assert_allclose(np.asarray(o), np.asarray(r),
                                   rtol=2e-3, atol=2e-3)
    refs_f = _reference_forward(x, y, z, params, quantize_matmul_to_bf16=False)
    for o, r in zip(outs, refs_f):
        np.testing.assert_allclose(np.asarray(o), np.asarray(r),
                                   rtol=5e-2, atol=5e-2)

    print("KERNEL_OK")
</pallas_src>

<mosaic_0001>
module attributes {stable_mosaic.version = 11 : i64} {
  func.func @_actor_observer_kernel(%arg0: i32, %arg1: i32, %arg2: memref<16x1024xf32, #tpu.memory_space<vmem>>, %arg3: memref<16x1024xf32, #tpu.memory_space<vmem>>, %arg4: memref<16x1024xf32, #tpu.memory_space<vmem>>, %arg5: memref<1024x32xbf16, #tpu.memory_space<vmem>>, %arg6: memref<1x32xf32, #tpu.memory_space<vmem>>, %arg7: memref<1x32xf32, #tpu.memory_space<vmem>>, %arg8: memref<1x32xf32, #tpu.memory_space<vmem>>, %arg9: memref<5xf32, #tpu.memory_space<smem>>, %arg10: memref<16x8xf32, #tpu.memory_space<vmem>>, %arg11: memref<16x32xf32, #tpu.memory_space<vmem>>, %arg12: memref<16x32xf32, #tpu.memory_space<vmem>>, %arg13: memref<16x32xf32, #tpu.memory_space<vmem>>) attributes {dimension_semantics = [#tpu.dimension_semantics<parallel>, #tpu.dimension_semantics<arbitrary>], iteration_bounds = array<i64: 1, 1>, scalar_prefetch = 0 : i64, scratch_operands = 3 : i64, tpu.core_type = #tpu.core_type<tc>, window_params = [{transform_indices = @transform_0, window_bounds = array<i64: 16, 1024>}, {transform_indices = @transform_1, window_bounds = array<i64: 16, 1024>}, {transform_indices = @transform_2, window_bounds = array<i64: 16, 1024>}, {transform_indices = @transform_3, window_bounds = array<i64: 1024, 32>}, {pipeline_mode = #tpu.pipeline_mode<synchronous>, transform_indices = @transform_4, window_bounds = array<i64: 1, 32>}, {pipeline_mode = #tpu.pipeline_mode<synchronous>, transform_indices = @transform_5, window_bounds = array<i64: 1, 32>}, {pipeline_mode = #tpu.pipeline_mode<synchronous>, transform_indices = @transform_6, window_bounds = array<i64: 1, 32>}, {transform_indices = @transform_7, window_bounds = array<i64: 5>}, {transform_indices = @transform_8, window_bounds = array<i64: 16, 8>}]} {
    %c0_i32 = arith.constant 0 : i32
    %0 = arith.cmpi eq, %arg1, %c0_i32 : i32
    %1 = arith.extui %0 : i1 to i32
    %c0_i32_0 = arith.constant 0 : i32
    %2 = arith.cmpi ne, %1, %c0_i32_0 : i32
    scf.if %2 {
      %cst_24 = arith.constant 0.000000e+00 : f32
      %25 = vector.broadcast %cst_24 : f32 to vector<16x32xf32>
      %c0_25 = arith.constant 0 : index
      %c0_26 = arith.constant 0 : index
      %26 = vector.load %arg11[%c0_25, %c0_26] : memref<16x32xf32, #tpu.memory_space<vmem>>, vector<16x32xf32>
      tpu.vector_store %arg11[%c0_25, %c0_26], %25 {strides = array<i32>} : memref<16x32xf32, #tpu.memory_space<vmem>>, vector<16x32xf32>,
      %cst_27 = arith.constant 0.000000e+00 : f32
      %27 = vector.broadcast %cst_27 : f32 to vector<16x32xf32>
      %c0_28 = arith.constant 0 : index
      %c0_29 = arith.constant 0 : index
      %28 = vector.load %arg12[%c0_28, %c0_29] : memref<16x32xf32, #tpu.memory_space<vmem>>, vector<16x32xf32>
      tpu.vector_store %arg12[%c0_28, %c0_29], %27 {strides = array<i32>} : memref<16x32xf32, #tpu.memory_space<vmem>>, vector<16x32xf32>,
      %cst_30 = arith.constant 0.000000e+00 : f32
      %29 = vector.broadcast %cst_30 : f32 to vector<16x32xf32>
      %c0_31 = arith.constant 0 : index
      %c0_32 = arith.constant 0 : index
      %30 = vector.load %arg13[%c0_31, %c0_32] : memref<16x32xf32, #tpu.memory_space<vmem>>, vector<16x32xf32>
      tpu.vector_store %arg13[%c0_31, %c0_32], %29 {strides = array<i32>} : memref<16x32xf32, #tpu.memory_space<vmem>>, vector<16x32xf32>,
    } else {
    }
    %c0 = arith.constant 0 : index
    %c0_1 = arith.constant 0 : index
    %3 = vector.load %arg5[%c0, %c0_1] : memref<1024x32xbf16, #tpu.memory_space<vmem>>, vector<1024x32xbf16>
    %c0_2 = arith.constant 0 : index
    %c0_3 = arith.constant 0 : index
    %4 = vector.load %arg11[%c0_2, %c0_3] : memref<16x32xf32, #tpu.memory_space<vmem>>, vector<16x32xf32>
    %c0_4 = arith.constant 0 : index
    %c0_5 = arith.constant 0 : index
    %5 = vector.load %arg2[%c0_4, %c0_5] : memref<16x1024xf32, #tpu.memory_space<vmem>>, vector<16x1024xf32>
    %6 = arith.truncf %5 : vector<16x1024xf32> to vector<16x1024xbf16>
    %cst = arith.constant dense<0.000000e+00> : vector<16x32xf32>
    %7 = tpu.matmul %6, %3, %cst {dimension_numbers = #tpu.dot_dimension_numbers<[1], [0], [0], [1], [0, 0, 1, 1], [], []>} : vector<16x1024xbf16>, vector<1024x32xbf16>, vector<16x32xf32> -> vector<16x32xf32>
    %8 = arith.addf %4, %7 : vector<16x32xf32>
    %c0_6 = arith.constant 0 : index
    %c0_7 = arith.constant 0 : index
    %9 = vector.load %arg11[%c0_6, %c0_7] : memref<16x32xf32, #tpu.memory_space<vmem>>, vector<16x32xf32>
    tpu.vector_store %arg11[%c0_6, %c0_7], %8 {strides = array<i32>} : memref<16x32xf32, #tpu.memory_space<vmem>>, vector<16x32xf32>,
    %c0_8 = arith.constant 0 : index
    %c0_9 = arith.constant 0 : index
    %10 = vector.load %arg12[%c0_8, %c0_9] : memref<16x32xf32, #tpu.memory_space<vmem>>, vector<16x32xf32>
    %c0_10 = arith.constant 0 : index
    %c0_11 = arith.constant 0 : index
    %11 = vector.load %arg3[%c0_10, %c0_11] : memref<16x1024xf32, #tpu.memory_space<vmem>>, vector<16x1024xf32>
    %12 = arith.truncf %11 : vector<16x1024xf32> to vector<16x1024xbf16>
    %cst_12 = arith.constant dense<0.000000e+00> : vector<16x32xf32>
    %13 = tpu.matmul %12, %3, %cst_12 {dimension_numbers = #tpu.dot_dimension_numbers<[1], [0], [0], [1], [0, 0, 1, 1], [], []>} : vector<16x1024xbf16>, vector<1024x32xbf16>, vector<16x32xf32> -> vector<16x32xf32>
    %14 = arith.addf %10, %13 : vector<16x32xf32>
    %c0_13 = arith.constant 0 : index
    %c0_14 = arith.constant 0 : index
    %15 = vector.load %arg12[%c0_13, %c0_14] : memref<16x32xf32, #tpu.memory_space<vmem>>, vector<16x32xf32>
    tpu.vector_store %arg12[%c0_13, %c0_14], %14 {strides = array<i32>} : memref<16x32xf32, #tpu.memory_space<vmem>>, vector<16x32xf32>,
    %c0_15 = arith.constant 0 : index
    %c0_16 = arith.constant 0 : index
    %16 = vector.load %arg13[%c0_15, %c0_16] : memref<16x32xf32, #tpu.memory_space<vmem>>, vector<16x32xf32>
    %c0_17 = arith.constant 0 : index
    %c0_18 = arith.constant 0 : index
    %17 = vector.load %arg4[%c0_17, %c0_18] : memref<16x1024xf32, #tpu.memory_space<vmem>>, vector<16x1024xf32>
    %18 = arith.truncf %17 : vector<16x1024xf32> to vector<16x1024xbf16>
    %cst_19 = arith.constant dense<0.000000e+00> : vector<16x32xf32>
    %19 = tpu.matmul %18, %3, %cst_19 {dimension_numbers = #tpu.dot_dimension_numbers<[1], [0], [0], [1], [0, 0, 1, 1], [], []>} : vector<16x1024xbf16>, vector<1024x32xbf16>, vector<16x32xf32> -> vector<16x32xf32>
    %20 = arith.addf %16, %19 : vector<16x32xf32>
    %c0_20 = arith.constant 0 : index
    %c0_21 = arith.constant 0 : index
    %21 = vector.load %arg13[%c0_20, %c0_21] : memref<16x32xf32, #tpu.memory_space<vmem>>, vector<16x32xf32>
    tpu.vector_store %arg13[%c0_20, %c0_21], %20 {strides = array<i32>} : memref<16x32xf32, #tpu.memory_space<vmem>>, vector<16x32xf32>,
    %c0_i32_22 = arith.constant 0 : i32
    %22 = arith.cmpi eq, %arg1, %c0_i32_22 : i32
    %23 = arith.extui %22 : i1 to i32
    %c0_i32_23 = arith.constant 0 : i32
    %24 = arith.cmpi ne, %23, %c0_i32_23 : i32
    scf.if %24 {
      %c0_24 = arith.constant 0 : index
      %c0_25 = arith.constant 0 : index
      %25 = vector.load %arg6[%c0_24, %c0_25] : memref<1x32xf32, #tpu.memory_space<vmem>>, vector<1x32xf32>
      %c0_26 = arith.constant 0 : index
      %c0_27 = arith.constant 0 : index
      %26 = vector.load %arg11[%c0_26, %c0_27] : memref<16x32xf32, #tpu.memory_space<vmem>>, vector<16x32xf32>
      %27 = vector.broadcast %25 : vector<1x32xf32> to vector<16x32xf32>
      %28 = arith.addf %26, %27 : vector<16x32xf32>
      %c0_28 = arith.constant 0 : index
      %c0_29 = arith.constant 0 : index
      %29 = vector.load %arg12[%c0_28, %c0_29] : memref<16x32xf32, #tpu.memory_space<vmem>>, vector<16x32xf32>
      %30 = vector.broadcast %25 : vector<1x32xf32> to vector<16x32xf32>
      %31 = arith.addf %29, %30 : vector<16x32xf32>
      %c0_30 = arith.constant 0 : index
      %c0_31 = arith.constant 0 : index
      %32 = vector.load %arg13[%c0_30, %c0_31] : memref<16x32xf32, #tpu.memory_space<vmem>>, vector<16x32xf32>
      %33 = vector.broadcast %25 : vector<1x32xf32> to vector<16x32xf32>
      %34 = arith.addf %32, %33 : vector<16x32xf32>
      %35 = arith.subf %28, %31 : vector<16x32xf32>
      %cst_32 = arith.constant 9.99999997E-7 : f32
      %36 = vector.broadcast %cst_32 : f32 to vector<16x32xf32>
      %37 = arith.addf %35, %36 : vector<16x32xf32>
      %38 = arith.mulf %37, %37 : vector<16x32xf32>
      %cst_33 = arith.constant dense<0.000000e+00> : vector<16xf32>
      %39 = vector.multi_reduction <add>, %38, %cst_33 [1] : vector<16x32xf32> to vector<16xf32>
      %40 = vector.shape_cast %39 : vector<16xf32> to vector<16x1xf32>
      %41 = math.sqrt %40 : vector<16x1xf32>
      %42 = arith.subf %31, %34 : vector<16x32xf32>
      %cst_34 = arith.constant 9.99999997E-7 : f32
      %43 = vector.broadcast %cst_34 : f32 to vector<16x32xf32>
      %44 = arith.addf %42, %43 : vector<16x32xf32>
      %45 = arith.mulf %44, %44 : vector<16x32xf32>
      %cst_35 = arith.constant dense<0.000000e+00> : vector<16xf32>
      %46 = vector.multi_reduction <add>, %45, %cst_35 [1] : vector<16x32xf32> to vector<16xf32>
      %47 = vector.shape_cast %46 : vector<16xf32> to vector<16x1xf32>
      %48 = math.sqrt %47 : vector<16x1xf32>
      %c0_36 = arith.constant 0 : index
      %49 = memref.load %arg9[%c0_36] : memref<5xf32, #tpu.memory_space<smem>>
      %c1 = arith.constant 1 : index
      %50 = memref.load %arg9[%c1] : memref<5xf32, #tpu.memory_space<smem>>
      %c2 = arith.constant 2 : index
      %51 = memref.load %arg9[%c2] : memref<5xf32, #tpu.memory_space<smem>>
      %c3 = arith.constant 3 : index
      %52 = memref.load %arg9[%c3] : memref<5xf32, #tpu.memory_space<smem>>
      %c4 = arith.constant 4 : index
      %53 = memref.load %arg9[%c4] : memref<5xf32, #tpu.memory_space<smem>>
      %c0_37 = arith.constant 0 : index
      %c0_38 = arith.constant 0 : index
      %54 = vector.load %arg7[%c0_37, %c0_38] : memref<1x32xf32, #tpu.memory_space<vmem>>, vector<1x32xf32>
      %c0_39 = arith.constant 0 : index
      %c0_40 = arith.constant 0 : index
      %55 = vector.load %arg8[%c0_39, %c0_40] : memref<1x32xf32, #tpu.memory_space<vmem>>, vector<1x32xf32>
      %56 = vector.broadcast %54 : vector<1x32xf32> to vector<16x32xf32>
      %57 = arith.mulf %28, %56 : vector<16x32xf32>
      %cst_41 = arith.constant dense<0.000000e+00> : vector<16xf32>
      %58 = vector.multi_reduction <add>, %57, %cst_41 [1] : vector<16x32xf32> to vector<16xf32>
      %59 = vector.shape_cast %58 : vector<16xf32> to vector<16x1xf32>
      %60 = vector.broadcast %49 : f32 to vector<16x1xf32>
      %61 = arith.addf %59, %60 : vector<16x1xf32>
      %62 = math.tanh %61 : vector<16x1xf32>
      %63 = vector.broadcast %51 : f32 to vector<16x1xf32>
      %64 = arith.mulf %62, %63 : vector<16x1xf32>
      %65 = vector.broadcast %55 : vector<1x32xf32> to vector<16x32xf32>
      %66 = arith.mulf %31, %65 : vector<16x32xf32>
      %cst_42 = arith.constant dense<0.000000e+00> : vector<16xf32>
      %67 = vector.multi_reduction <add>, %66, %cst_42 [1] : vector<16x32xf32> to vector<16xf32>
      %68 = vector.shape_cast %67 : vector<16xf32> to vector<16x1xf32>
      %69 = vector.broadcast %50 : f32 to vector<16x1xf32>
      %70 = arith.addf %68, %69 : vector<16x1xf32>
      %71 = math.tanh %70 : vector<16x1xf32>
      %72 = vector.broadcast %52 : f32 to vector<16x1xf32>
      %73 = arith.mulf %71, %72 : vector<16x1xf32>
      %74 = vector.broadcast %54 : vector<1x32xf32> to vector<16x32xf32>
      %75 = arith.mulf %34, %74 : vector<16x32xf32>
      %cst_43 = arith.constant dense<0.000000e+00> : vector<16xf32>
      %76 = vector.multi_reduction <add>, %75, %cst_43 [1] : vector<16x32xf32> to vector<16xf32>
      %77 = vector.shape_cast %76 : vector<16xf32> to vector<16x1xf32>
      %78 = vector.broadcast %49 : f32 to vector<16x1xf32>
      %79 = arith.addf %77, %78 : vector<16x1xf32>
      %80 = math.tanh %79 : vector<16x1xf32>
      %81 = vector.broadcast %53 : f32 to vector<16x1xf32>
      %82 = arith.mulf %80, %81 : vector<16x1xf32>
      %cst_44 = arith.constant 0.000000e+00 : f32
      %83 = vector.broadcast %cst_44 : f32 to vector<16x3xf32>
      %84 = tpu.concatenate %41, %48, %64, %73, %82, %83 in 1 : vector<16x1xf32>, vector<16x1xf32>, vector<16x1xf32>, vector<16x1xf32>, vector<16x1xf32>, vector<16x3xf32> -> vector<16x8xf32>
      %c0_45 = arith.constant 0 : index
      %c0_46 = arith.constant 0 : index
      %85 = vector.load %arg10[%c0_45, %c0_46] : memref<16x8xf32, #tpu.memory_space<vmem>>, vector<16x8xf32>
      tpu.vector_store %arg10[%c0_45, %c0_46], %84 {strides = array<i32>} : memref<16x8xf32, #tpu.memory_space<vmem>>, vector<16x8xf32>,
    } else {
    }
    return
  }
  func.func @transform_0(%arg0: i32, %arg1: i32) -> (i32, i32) {
    %c0_i32 = arith.constant 0 : i32
    return %arg0, %arg1 : i32, i32
  }
  func.func @transform_1(%arg0: i32, %arg1: i32) -> (i32, i32) {
    %c0_i32 = arith.constant 0 : i32
    return %arg0, %arg1 : i32, i32
  }
  func.func @transform_2(%arg0: i32, %arg1: i32) -> (i32, i32) {
    %c0_i32 = arith.constant 0 : i32
    return %arg0, %arg1 : i32, i32
  }
  func.func @transform_3(%arg0: i32, %arg1: i32) -> (i32, i32) {
    %c0_i32 = arith.constant 0 : i32
    %c0_i32_0 = arith.constant 0 : i32
    return %arg1, %c0_i32 : i32, i32
  }
  func.func @transform_4(%arg0: i32, %arg1: i32) -> (i32, i32) {
    %c0_i32 = arith.constant 0 : i32
    %c0_i32_0 = arith.constant 0 : i32
    %c0_i32_1 = arith.constant 0 : i32
    return %c0_i32, %c0_i32_0 : i32, i32
  }
  func.func @transform_5(%arg0: i32, %arg1: i32) -> (i32, i32) {
    %c0_i32 = arith.constant 0 : i32
    %c0_i32_0 = arith.constant 0 : i32
    %c0_i32_1 = arith.constant 0 : i32
    return %c0_i32, %c0_i32_0 : i32, i32
  }
  func.func @transform_6(%arg0: i32, %arg1: i32) -> (i32, i32) {
    %c0_i32 = arith.constant 0 : i32
    %c0_i32_0 = arith.constant 0 : i32
    %c0_i32_1 = arith.constant 0 : i32
    return %c0_i32, %c0_i32_0 : i32, i32
  }
  func.func @transform_7(%arg0: i32, %arg1: i32) -> i32 {
    %c0_i32 = arith.constant 0 : i32
    %c0_i32_0 = arith.constant 0 : i32
    return %c0_i32 : i32
  }
  func.func @transform_8(%arg0: i32, %arg1: i32) -> (i32, i32) {
    %c0_i32 = arith.constant 0 : i32
    %c0_i32_0 = arith.constant 0 : i32
    return %arg0, %c0_i32 : i32, i32
  }
}

</mosaic_0001>

<bundles_post_ra>
// kernel: tpu_custom_call.1
= control target key start
LH: loop header
LB: loop body
LE: loop exit
PB: predicated region body
PF: predicated region fallthrough
CT: control target
= control target key end

     0   :  { %13 = vsyncpa [#allocation6], 0  ;;  %s1529_s30 = smov [#allocation5]   ;;  %s2346_s0 = inlined_call_operand.vmem [shape: f32[16,1024], index: 0, kind: input, shape index: {}]   ;;  %s2347_s1 = inlined_call_operand.vmem [shape: f32[16,1024], index: 1, kind: input, shape index: {}]   ;;  %s2348_s2 = inlined_call_operand.vmem [shape: f32[16,1024], index: 2, kind: input, shape index: {}]   ;;  %s2349_s3 = inlined_call_operand.vmem [shape: bf16[1024,32], index: 3, kind: input, shape index: {}]   ;;  %s2350_s4 = inlined_call_operand.vmem [shape: f32[1,32], index: 4, kind: input, shape index: {}]   ;;  %s2351_s5 = inlined_call_operand.vmem [shape: f32[1,32], index: 5, kind: input, shape index: {}]   ;;  %s2352_s6 = inlined_call_operand.vmem [shape: f32[1,32], index: 6, kind: input, shape index: {}]   ;;  %s2353_s7 = inlined_call_operand.vmem [shape: f32[5], index: 7, kind: input, shape index: {}]   ;;  %s2354_s8 = inlined_call_operand.vmem [shape: f32[16,8], index: 8, kind: output, shape index: {}]  }
   0x1   :  { %s33_s29 = sshll.u32 %s2353_s7, 4  ;;  %s34_s29 = int_to_ptr.vmem [resolvable:$true] %s33_s29 }
   0x2   :  { %36 = dma.vmem_to_smem %s34_s29, 16, %s1529_s30, [#allocation6]  }
   0x3   :  { %1527 = dma.done.wait [#allocation6], 16  }
   0x4   :  { %1528 = vsyncadd [#allocation6], 4294967280 }
   0x5   :  { %41 = sfence }
   0x6   :  { %v1582_v0 = vld [vmem:[%s2349_s3 + $0x38] sm:$0xff]  ;;  %v1604_v4 = vld [vmem:[%s2349_s3 + $0x30] sm:$0xff]  ;;  %v1628_v8 = vld [vmem:[%s2349_s3 + $0x28] sm:$0xff]  ;;  %vm46_vm0 = vcmask 261120   ;;  %s2292_s20 = sld [smem:[#allocation5 + $0x1]]  ;;  %vm1143_vm4 = vcmask 7168  }
   0x7   :  { %v1587_v1 = vld [vmem:[%s2349_s3 + $0x78] sm:$0xff]  ;;  %591 = vmatpush.bf16.msra.mxu0 %v1582_v0  ;;  %v1609_v5 = vld [vmem:[%s2349_s3 + $0x70] sm:$0xff]  ;;  %v1633_v9 = vld [vmem:[%s2349_s3 + $0x68] sm:$0xff]  ;;  %s2295_s21 = sld [smem:[#allocation5 + $0x2]]  ;;  %vm1146_vm6 = vcmask 15360   ;;  %vm1149_vm7 = vcmask 23552  }
   0x8   :  { %v1592_v2 = vld [vmem:[%s2349_s3 + $0xb8] sm:$0xff]  ;;  %605 = vmatpush.bf16.msra.mxu1 %v1587_v1  ;;  %v1616_v6 = vld [vmem:[%s2349_s3 + $0xb0] sm:$0xff]  ;;  %v1640_v10 = vld [vmem:[%s2349_s3 + $0xa8] sm:$0xff]  ;;  %s2302_s22 = sld [smem:[#allocation5 + $0x4]]  ;;  %vm1152_vm8 = vcmask 31744   ;;  %vm1155_vm9 = vcmask 39936  }
   0x9   :  { %v1597_v3 = vld [vmem:[%s2349_s3 + $0xf8] sm:$0xff]  ;;  %619 = vmatpush.bf16.msra.mxu2 %v1592_v2  ;;  %v1621_v7 = vld [vmem:[%s2349_s3 + $0xf0] sm:$0xff]  ;;  %v1645_v11 = vld [vmem:[%s2349_s3 + $0xe8] sm:$0xff]  ;;  %vm1158_vm10 = vcmask 64512  }
   0xa   :  { %633 = vmatpush.bf16.msra.mxu3 %v1597_v3  ;;  %v1652_v12 = vld [vmem:[%s2349_s3 + $0x20] sm:$0xff]  ;;  %v1676_v16 = vld [vmem:[%s2349_s3 + $0x18] sm:$0xff]  ;;  %v1700_v20 = vld [vmem:[%s2349_s3 + $0x10] sm:$0xff] }
   0xb   :  { %592 = vmatpush.bf16.msra.mxu0 %v1604_v4  ;;  %v1657_v13 = vld [vmem:[%s2349_s3 + $0x60] sm:$0xff]  ;;  %v1681_v17 = vld [vmem:[%s2349_s3 + $0x58] sm:$0xff]  ;;  %v1705_v21 = vld [vmem:[%s2349_s3 + $0x50] sm:$0xff] }
   0xc   :  { %606 = vmatpush.bf16.msra.mxu1 %v1609_v5  ;;  %v1664_v14 = vld [vmem:[%s2349_s3 + $0xa0] sm:$0xff]  ;;  %v1688_v18 = vld [vmem:[%s2349_s3 + $0x98] sm:$0xff]  ;;  %v1712_v22 = vld [vmem:[%s2349_s3 + $0x90] sm:$0xff] }
   0xd   :  { %620 = vmatpush.bf16.msra.mxu2 %v1616_v6  ;;  %v1669_v15 = vld [vmem:[%s2349_s3 + $0xe0] sm:$0xff]  ;;  %v1693_v19 = vld [vmem:[%s2349_s3 + $0xd8] sm:$0xff]  ;;  %v1717_v23 = vld [vmem:[%s2349_s3 + $0xd0] sm:$0xff] }
   0xe   :  { %634 = vmatpush.bf16.msra.mxu3 %v1621_v7  ;;  %v1722_v24 = vld [vmem:[%s2349_s3 + $0x8] sm:$0xff]  ;;  %v1746_v28 = vld [vmem:[%s2349_s3] sm:$0xff]  ;;  %v1768_v32 = vld [vmem:[%s2349_s3 + $0x138] sm:$0xff] }
   0xf   :  { %593 = vmatpush.bf16.msra.mxu0 %v1628_v8  ;;  %v1729_v25 = vld [vmem:[%s2349_s3 + $0x48] sm:$0xff]  ;;  %v1751_v29 = vld [vmem:[%s2349_s3 + $0x40] sm:$0xff]  ;;  %v1773_v33 = vld [vmem:[%s2349_s3 + $0x178] sm:$0xff] }
  0x10   :  { %607 = vmatpush.bf16.msra.mxu1 %v1633_v9  ;;  %v1736_v26 = vld [vmem:[%s2349_s3 + $0x88] sm:$0xff]  ;;  %v1756_v30 = vld [vmem:[%s2349_s3 + $0x80] sm:$0xff]  ;;  %v185_v36 = vld [vmem:[%s2346_s0 + $0x10] sm:$0xff] }
  0x11   :  { %621 = vmatpush.bf16.msra.mxu2 %v1640_v10  ;;  %v1741_v27 = vld [vmem:[%s2349_s3 + $0xc8] sm:$0xff]  ;;  %v1761_v31 = vld [vmem:[%s2349_s3 + $0xc0] sm:$0xff]  ;;  %v193_v37 = vld [vmem:[%s2346_s0 + $0x50] sm:$0xff] }
  0x12   :  { %635 = vmatpush.bf16.msra.mxu3 %v1645_v11  ;;  %v183_v34 = vld [vmem:[%s2346_s0] sm:$0xff]  ;;  %v184_v38 = vld [vmem:[%s2346_s0 + $0x8] sm:$0xff]  ;;  %v186_v40 = vld [vmem:[%s2346_s0 + $0x18] sm:$0xff]  ;;  %v201_v45 = vpack.c.bf16 %v193_v37, %v185_v36 }
  0x13   :  { %594 = vmatpush.bf16.msra.mxu0 %v1652_v12  ;;  %v191_v35 = vld [vmem:[%s2346_s0 + $0x40] sm:$0xff]  ;;  %v192_v39 = vld [vmem:[%s2346_s0 + $0x48] sm:$0xff]  ;;  %v194_v41 = vld [vmem:[%s2346_s0 + $0x58] sm:$0xff] }
  0x14   :  { %608 = vmatpush.bf16.msra.mxu1 %v1657_v13  ;;  %v1804_v42 = vld [vmem:[%s2349_s3 + $0x1b8] sm:$0xff]  ;;  %v199_v44 = vpack.c.bf16 %v191_v35, %v183_v34  ;;  %v200_v46 = vpack.c.bf16 %v192_v39, %v184_v38  ;;  %v202_v47 = vpack.c.bf16 %v194_v41, %v186_v40  ;;  %v1820_v48 = vld [vmem:[%s2349_s3 + $0x130] sm:$0xff]  ;;  %v1844_v52 = vld [vmem:[%s2349_s3 + $0x128] sm:$0xff] }
  0x15   :  { %622 = vmatpush.bf16.msra.mxu2 %v1664_v14  ;;  %v1809_v43 = vld [vmem:[%s2349_s3 + $0x1f8] sm:$0xff]  ;;  %v1825_v49 = vld [vmem:[%s2349_s3 + $0x170] sm:$0xff]  ;;  %v1849_v53 = vld [vmem:[%s2349_s3 + $0x168] sm:$0xff] }
  0x16   :  { %636 = vmatpush.bf16.msra.mxu3 %v1669_v15  ;;  %v1832_v50 = vld [vmem:[%s2349_s3 + $0x1b0] sm:$0xff]  ;;  %v1856_v54 = vld [vmem:[%s2349_s3 + $0x1a8] sm:$0xff]  ;;  %v1868_v56 = vld [vmem:[%s2349_s3 + $0x120] sm:$0xff] }
  0x17   :  { %595 = vmatpush.bf16.msra.mxu0 %v1676_v16  ;;  %v1837_v51 = vld [vmem:[%s2349_s3 + $0x1f0] sm:$0xff]  ;;  %v1861_v55 = vld [vmem:[%s2349_s3 + $0x1e8] sm:$0xff]  ;;  %v1873_v57 = vld [vmem:[%s2349_s3 + $0x160] sm:$0xff] }
  0x18   :  { %609 = vmatpush.bf16.msra.mxu1 %v1681_v17  ;;  %v1880_v58 = vld [vmem:[%s2349_s3 + $0x1a0] sm:$0xff]  ;;  %v1892_v60 = vld [vmem:[%s2349_s3 + $0x118] sm:$0xff]  ;;  %v1916_v34 = vld [vmem:[%s2349_s3 + $0x110] sm:$0xff] }
  0x19   :  { %623 = vmatpush.bf16.msra.mxu2 %v1688_v18  ;;  %v1885_v59 = vld [vmem:[%s2349_s3 + $0x1e0] sm:$0xff]  ;;  %2379 = vst [vmem:[#allocation8_spill] sm:$0xff] %v1892_v60  ;;  %v1897_v61 = vld [vmem:[%s2349_s3 + $0x158] sm:$0xff]  ;;  %v1921_v35 = vld [vmem:[%s2349_s3 + $0x150] sm:$0xff] }
  0x1a   :  { %637 = vmatpush.bf16.msra.mxu3 %v1693_v19  ;;  %2380 = vst [vmem:[#allocation9_spill] sm:$0xff] %v1897_v61  ;;  %v1904_v62 = vld [vmem:[%s2349_s3 + $0x198] sm:$0xff]  ;;  %v1928_v36 = vld [vmem:[%s2349_s3 + $0x190] sm:$0xff]  ;;  %v1940_v38 = vld [vmem:[%s2349_s3 + $0x108] sm:$0xff] }
  0x1b   :  { %596 = vmatpush.bf16.msra.mxu0 %v1700_v20  ;;  %2381 = vst [vmem:[#allocation10_spill] sm:$0xff] %v1904_v62  ;;  %v1909_v63 = vld [vmem:[%s2349_s3 + $0x1d8] sm:$0xff]  ;;  %v1933_v37 = vld [vmem:[%s2349_s3 + $0x1d0] sm:$0xff]  ;;  %v1945_v39 = vld [vmem:[%s2349_s3 + $0x148] sm:$0xff] }
  0x1c   :  { %610 = vmatpush.bf16.msra.mxu1 %v1705_v21  ;;  %2382 = vst [vmem:[#allocation11_spill] sm:$0xff] %v1909_v63  ;;  %v1952_v40 = vld [vmem:[%s2349_s3 + $0x188] sm:$0xff] }
  0x1d   :  { %624 = vmatpush.bf16.msra.mxu2 %v1712_v22  ;;  %2383 = vst [vmem:[#allocation12_spill] sm:$0xff] %v1916_v34  ;;  %v1957_v41 = vld [vmem:[%s2349_s3 + $0x1c8] sm:$0xff] }
  0x1e   :  { %638 = vmatpush.bf16.msra.mxu3 %v1717_v23  ;;  %2384 = vst [vmem:[#allocation13_spill] sm:$0xff] %v1921_v35 }
  0x1f   :  { %597 = vmatpush.bf16.msra.mxu0 %v1722_v24  ;;  %2385 = vst [vmem:[#allocation14_spill] sm:$0xff] %v1928_v36 }
  0x20   :  { %611 = vmatpush.bf16.msra.mxu1 %v1729_v25  ;;  %2386 = vst [vmem:[#allocation15_spill] sm:$0xff] %v1933_v37 }
  0x21   :  { %625 = vmatpush.bf16.msra.mxu2 %v1736_v26  ;;  %2387 = vst [vmem:[#allocation16_spill] sm:$0xff] %v1940_v38 }
  0x22   :  { %639 = vmatpush.bf16.msra.mxu3 %v1741_v27  ;;  %2388 = vst [vmem:[#allocation17_spill] sm:$0xff] %v1945_v39 }
  0x23   :  { %598 = vmatpush.bf16.msra.mxu0 %v1746_v28  ;;  %2389 = vst [vmem:[#allocation18_spill] sm:$0xff] %v1952_v40 }
  0x24   :  { %612 = vmatpush.bf16.msra.mxu1 %v1751_v29  ;;  %2390 = vst [vmem:[#allocation19_spill] sm:$0xff] %v1957_v41 }
  0x25   :  { %626 = vmatpush.bf16.msra.mxu2 %v1756_v30 }
  0x26   :  { %640 = vmatpush.bf16.msra.mxu3 %v1761_v31  ;;  %599 = vmatmul.bf16.vlgmr.msra.gmra.mxu0 %v199_v44  ;;  %v1962_v44 = vld [vmem:[%s2349_s3 + $0x100] sm:$0xff] }
  0x27   :  { %647 = vmatpush.bf16.msrb.mxu0 %v1768_v32  ;;  %613 = vmatmul.bf16.vlgmr.msra.gmra.mxu1 %v200_v46  ;;  %v1972_v46 = vld [vmem:[%s2349_s3 + $0x180] sm:$0xff] }
  0x28   :  { %661 = vmatpush.bf16.msrb.mxu1 %v1773_v33  ;;  %627 = vmatmul.bf16.vlgmr.msra.gmra.mxu2 %v201_v45  ;;  %v1967_v45 = vld [vmem:[%s2349_s3 + $0x140] sm:$0xff] }
  0x29   :  { %675 = vmatpush.bf16.msrb.mxu2 %v1804_v42  ;;  %641 = vmatmul.bf16.vlgmr.msra.gmra.mxu3 %v202_v47  ;;  %v1979_v47 = vld [vmem:[%s2349_s3 + $0x1c0] sm:$0xff]  ;;  %s2298_s3 = sld [smem:[#allocation5 + $0x3]] }
  0x2a   :  { %689 = vmatpush.bf16.msrb.mxu3 %v1809_v43 }
  0x2b   :  { %648 = vmatpush.bf16.msrb.mxu0 %v1820_v48 }
  0x2c   :  { %662 = vmatpush.bf16.msrb.mxu1 %v1825_v49 }
  0x2d   :  { %676 = vmatpush.bf16.msrb.mxu2 %v1832_v50 }
  0x2e   :  { %690 = vmatpush.bf16.msrb.mxu3 %v1837_v51 }
  0x2f   :  { %649 = vmatpush.bf16.msrb.mxu0 %v1844_v52 }
  0x30   :  { %663 = vmatpush.bf16.msrb.mxu1 %v1849_v53 }
  0x31   :  { %677 = vmatpush.bf16.msrb.mxu2 %v1856_v54 }
  0x32   :  { %691 = vmatpush.bf16.msrb.mxu3 %v1861_v55 }
  0x33   :  { %650 = vmatpush.bf16.msrb.mxu0 %v1868_v56 }
  0x34   :  { %664 = vmatpush.bf16.msrb.mxu1 %v1873_v57 }
  0x35   :  { %678 = vmatpush.bf16.msrb.mxu2 %v1880_v58 }
  0x36   :  { %692 = vmatpush.bf16.msrb.mxu3 %v1885_v59 }
  0x37   :  { %651 = vmatpush.bf16.msrb.mxu0 %v1892_v60 }
  0x38   :  { %665 = vmatpush.bf16.msrb.mxu1 %v1897_v61 }
  0x39   :  { %679 = vmatpush.bf16.msrb.mxu2 %v1904_v62 }
  0x3a   :  { %693 = vmatpush.bf16.msrb.mxu3 %v1909_v63 }
  0x3b   :  { %652 = vmatpush.bf16.msrb.mxu0 %v1916_v34  ;;  %v196_v34 = vld [vmem:[%s2346_s0 + $0x68] sm:$0xff] }
  0x3c   :  { %666 = vmatpush.bf16.msrb.mxu1 %v1921_v35  ;;  %v188_v35 = vld [vmem:[%s2346_s0 + $0x28] sm:$0xff] }
  0x3d   :  { %680 = vmatpush.bf16.msrb.mxu2 %v1928_v36  ;;  %v195_v36 = vld [vmem:[%s2346_s0 + $0x60] sm:$0xff]  ;;  %v204_v61 = vpack.c.bf16 %v196_v34, %v188_v35  ;;  %v711_v34 = vld [vmem:[%s2347_s1 + $0x8] sm:$0xff] }
  0x3e   :  { %694 = vmatpush.bf16.msrb.mxu3 %v1933_v37  ;;  %v187_v37 = vld [vmem:[%s2346_s0 + $0x20] sm:$0xff]  ;;  %v719_v35 = vld [vmem:[%s2347_s1 + $0x48] sm:$0xff] }
  0x3f   :  { %653 = vmatpush.bf16.msrb.mxu0 %v1940_v38  ;;  %v197_v38 = vld [vmem:[%s2346_s0 + $0x70] sm:$0xff]  ;;  %v203_v63 = vpack.c.bf16 %v195_v36, %v187_v37  ;;  %v713_v36 = vld [vmem:[%s2347_s1 + $0x18] sm:$0xff] }
  0x40   :  { %667 = vmatpush.bf16.msrb.mxu1 %v1945_v39  ;;  %v189_v39 = vld [vmem:[%s2346_s0 + $0x30] sm:$0xff]  ;;  %v721_v37 = vld [vmem:[%s2347_s1 + $0x58] sm:$0xff] }
  0x41   :  { %681 = vmatpush.bf16.msrb.mxu2 %v1952_v40  ;;  %v198_v40 = vld [vmem:[%s2346_s0 + $0x78] sm:$0xff]  ;;  %v205_v62 = vpack.c.bf16 %v197_v38, %v189_v39 }
  0x42   :  { %695 = vmatpush.bf16.msrb.mxu3 %v1957_v41  ;;  %v190_v41 = vld [vmem:[%s2346_s0 + $0x38] sm:$0xff] }
  0x43   :  { %654 = vmatpush.bf16.msrb.mxu0 %v1962_v44  ;;  %v206_v60 = vpack.c.bf16 %v198_v40, %v190_v41  ;;  %v727_v40 = vpack.c.bf16 %v719_v35, %v711_v34  ;;  %v729_v41 = vpack.c.bf16 %v721_v37, %v713_v36  ;;  %v2395_v34 = vld [vmem:[#allocation12_spill] sm:$0xff]  ;;  %v2396_v35 = vld [vmem:[#allocation13_spill] sm:$0xff]  ;;  %v2397_v36 = vld [vmem:[#allocation14_spill] sm:$0xff] }
  0x44   :  { %668 = vmatpush.bf16.msrb.mxu1 %v1967_v45  ;;  %v2398_v37 = vld [vmem:[#allocation15_spill] sm:$0xff] }
  0x45   :  { %682 = vmatpush.bf16.msrb.mxu2 %v1972_v46 }
  0x46   :  { %696 = vmatpush.bf16.msrb.mxu3 %v1979_v47  ;;  %655 = vmatmul.bf16.vlgmr.msrb.gmra.mxu0 %v203_v63  ;;  %v720_v63 = vld [vmem:[%s2347_s1 + $0x50] sm:$0xff] }
  0x47   :  { %734 = vmatpush.bf16.msra.mxu0 %v1582_v0  ;;  %669 = vmatmul.bf16.vlgmr.msrb.gmra.mxu1 %v204_v61  ;;  %v718_v61 = vld [vmem:[%s2347_s1 + $0x40] sm:$0xff] }
  0x48   :  { %748 = vmatpush.bf16.msra.mxu1 %v1587_v1  ;;  %683 = vmatmul.bf16.vlgmr.msrb.gmra.mxu2 %v205_v62  ;;  %v712_v62 = vld [vmem:[%s2347_s1 + $0x10] sm:$0xff] }
  0x49   :  { %762 = vmatpush.bf16.msra.mxu2 %v1592_v2  ;;  %697 = vmatmul.bf16.vlgmr.msrb.gmra.mxu3 %v206_v60  ;;  %v710_v60 = vld [vmem:[%s2347_s1] sm:$0xff]  ;;  %v728_v39 = vpack.c.bf16 %v720_v63, %v712_v62  ;;  %v2394_v63 = vld [vmem:[#allocation11_spill] sm:$0xff] }
  0x4a   :  { %776 = vmatpush.bf16.msra.mxu3 %v1597_v3  ;;  %v726_v38 = vpack.c.bf16 %v718_v61, %v710_v60  ;;  %v2391_v60 = vld [vmem:[#allocation8_spill] sm:$0xff]  ;;  %v2392_v61 = vld [vmem:[#allocation9_spill] sm:$0xff]  ;;  %v2393_v62 = vld [vmem:[#allocation10_spill] sm:$0xff] }
  0x4b   :  { %735 = vmatpush.bf16.msra.mxu0 %v1604_v4 }
  0x4c   :  { %749 = vmatpush.bf16.msra.mxu1 %v1609_v5 }
  0x4d   :  { %763 = vmatpush.bf16.msra.mxu2 %v1616_v6 }
  0x4e   :  { %777 = vmatpush.bf16.msra.mxu3 %v1621_v7 }
  0x4f   :  { %736 = vmatpush.bf16.msra.mxu0 %v1628_v8 }
  0x50   :  { %750 = vmatpush.bf16.msra.mxu1 %v1633_v9 }
  0x51   :  { %764 = vmatpush.bf16.msra.mxu2 %v1640_v10 }
  0x52   :  { %778 = vmatpush.bf16.msra.mxu3 %v1645_v11 }
  0x53   :  { %737 = vmatpush.bf16.msra.mxu0 %v1652_v12 }
  0x54   :  { %751 = vmatpush.bf16.msra.mxu1 %v1657_v13 }
  0x55   :  { %765 = vmatpush.bf16.msra.mxu2 %v1664_v14 }
  0x56   :  { %779 = vmatpush.bf16.msra.mxu3 %v1669_v15 }
  0x57   :  { %738 = vmatpush.bf16.msra.mxu0 %v1676_v16 }
  0x58   :  { %752 = vmatpush.bf16.msra.mxu1 %v1681_v17 }
  0x59   :  { %766 = vmatpush.bf16.msra.mxu2 %v1688_v18 }
  0x5a   :  { %780 = vmatpush.bf16.msra.mxu3 %v1693_v19 }
  0x5b   :  { %739 = vmatpush.bf16.msra.mxu0 %v1700_v20 }
  0x5c   :  { %753 = vmatpush.bf16.msra.mxu1 %v1705_v21 }
  0x5d   :  { %767 = vmatpush.bf16.msra.mxu2 %v1712_v22 }
  0x5e   :  { %781 = vmatpush.bf16.msra.mxu3 %v1717_v23 }
  0x5f   :  { %740 = vmatpush.bf16.msra.mxu0 %v1722_v24 }
  0x60   :  { %754 = vmatpush.bf16.msra.mxu1 %v1729_v25 }
  0x61   :  { %768 = vmatpush.bf16.msra.mxu2 %v1736_v26 }
  0x62   :  { %782 = vmatpush.bf16.msra.mxu3 %v1741_v27 }
  0x63   :  { %741 = vmatpush.bf16.msra.mxu0 %v1746_v28 }
  0x64   :  { %755 = vmatpush.bf16.msra.mxu1 %v1751_v29 }
  0x65   :  { %769 = vmatpush.bf16.msra.mxu2 %v1756_v30 }
  0x66   :  { %783 = vmatpush.bf16.msra.mxu3 %v1761_v31  ;;  %742 = vmatmul.bf16.vlgmr.msra.gmra.mxu0 %v726_v38  ;;  %v2399_v38 = vld [vmem:[#allocation16_spill] sm:$0xff] }
  0x67   :  { %790 = vmatpush.bf16.msrb.mxu0 %v1768_v32  ;;  %756 = vmatmul.bf16.vlgmr.msra.gmra.mxu1 %v727_v40  ;;  %v714_v40 = vld [vmem:[%s2347_s1 + $0x20] sm:$0xff] }
  0x68   :  { %804 = vmatpush.bf16.msrb.mxu1 %v1773_v33  ;;  %770 = vmatmul.bf16.vlgmr.msra.gmra.mxu2 %v728_v39  ;;  %v2400_v39 = vld [vmem:[#allocation17_spill] sm:$0xff] }
  0x69   :  { %818 = vmatpush.bf16.msrb.mxu2 %v1804_v42  ;;  %784 = vmatmul.bf16.vlgmr.msra.gmra.mxu3 %v729_v41  ;;  %v722_v41 = vld [vmem:[%s2347_s1 + $0x60] sm:$0xff] }
  0x6a   :  { %832 = vmatpush.bf16.msrb.mxu3 %v1809_v43 }
  0x6b   :  { %791 = vmatpush.bf16.msrb.mxu0 %v1820_v48 }
  0x6c   :  { %805 = vmatpush.bf16.msrb.mxu1 %v1825_v49 }
  0x6d   :  { %819 = vmatpush.bf16.msrb.mxu2 %v1832_v50 }
  0x6e   :  { %833 = vmatpush.bf16.msrb.mxu3 %v1837_v51 }
  0x6f   :  { %792 = vmatpush.bf16.msrb.mxu0 %v1844_v52 }
  0x70   :  { %806 = vmatpush.bf16.msrb.mxu1 %v1849_v53 }
  0x71   :  { %820 = vmatpush.bf16.msrb.mxu2 %v1856_v54 }
  0x72   :  { %834 = vmatpush.bf16.msrb.mxu3 %v1861_v55 }
  0x73   :  { %793 = vmatpush.bf16.msrb.mxu0 %v1868_v56 }
  0x74   :  { %807 = vmatpush.bf16.msrb.mxu1 %v1873_v57 }
  0x75   :  { %821 = vmatpush.bf16.msrb.mxu2 %v1880_v58 }
  0x76   :  { %835 = vmatpush.bf16.msrb.mxu3 %v1885_v59 }
  0x77   :  { %794 = vmatpush.bf16.msrb.mxu0 %v2391_v60 }
  0x78   :  { %808 = vmatpush.bf16.msrb.mxu1 %v2392_v61 }
  0x79   :  { %822 = vmatpush.bf16.msrb.mxu2 %v2393_v62 }
  0x7a   :  { %836 = vmatpush.bf16.msrb.mxu3 %v2394_v63  ;;  %v2401_v63 = vld [vmem:[#allocation18_spill] sm:$0xff] }
  0x7b   :  { %795 = vmatpush.bf16.msrb.mxu0 %v2395_v34  ;;  %v2402_v34 = vld [vmem:[#allocation19_spill] sm:$0xff] }
  0x7c   :  { %809 = vmatpush.bf16.msrb.mxu1 %v2396_v35  ;;  %v730_v35 = vpack.c.bf16 %v722_v41, %v714_v40 }
  0x7d   :  { %823 = vmatpush.bf16.msrb.mxu2 %v2397_v36  ;;  %v723_v36 = vld [vmem:[%s2347_s1 + $0x68] sm:$0xff] }
  0x7e   :  { %837 = vmatpush.bf16.msrb.mxu3 %v2398_v37  ;;  %v716_v37 = vld [vmem:[%s2347_s1 + $0x30] sm:$0xff] }
  0x7f   :  { %796 = vmatpush.bf16.msrb.mxu0 %v2399_v38  ;;  %v715_v38 = vld [vmem:[%s2347_s1 + $0x28] sm:$0xff] }
  0x80   :  { %810 = vmatpush.bf16.msrb.mxu1 %v2400_v39  ;;  %v724_v39 = vld [vmem:[%s2347_s1 + $0x70] sm:$0xff]  ;;  %v731_v61 = vpack.c.bf16 %v723_v36, %v715_v38 }
  0x81   :  { %824 = vmatpush.bf16.msrb.mxu2 %v2401_v63  ;;  %v725_v63 = vld [vmem:[%s2347_s1 + $0x78] sm:$0xff]  ;;  %v732_v62 = vpack.c.bf16 %v724_v39, %v716_v37 }
  0x82   :  { %838 = vmatpush.bf16.msrb.mxu3 %v2402_v34  ;;  %v717_v34 = vld [vmem:[%s2347_s1 + $0x38] sm:$0xff] }
  0x83   :  { %797 = vmatpush.bf16.msrb.mxu0 %v1962_v44  ;;  %v733_v60 = vpack.c.bf16 %v725_v63, %v717_v34 }
  0x84   :  { %811 = vmatpush.bf16.msrb.mxu1 %v1967_v45 }
  0x85   :  { %825 = vmatpush.bf16.msrb.mxu2 %v1972_v46 }
  0x86   :  { %839 = vmatpush.bf16.msrb.mxu3 %v1979_v47  ;;  %798 = vmatmul.bf16.vlgmr.msrb.gmra.mxu0 %v730_v35 }
  0x87   :  { %876 = vmatpush.bf16.msra.mxu0 %v1582_v0  ;;  %812 = vmatmul.bf16.vlgmr.msrb.gmra.mxu1 %v731_v61  ;;  %v854_v0 = vld [vmem:[%s2348_s2 + $0x10] sm:$0xff] }
  0x88   :  { %890 = vmatpush.bf16.msra.mxu1 %v1587_v1  ;;  %826 = vmatmul.bf16.vlgmr.msrb.gmra.mxu2 %v732_v62  ;;  %v862_v1 = vld [vmem:[%s2348_s2 + $0x50] sm:$0xff] }
  0x89   :  { %904 = vmatpush.bf16.msra.mxu2 %v1592_v2  ;;  %840 = vmatmul.bf16.vlgmr.msrb.gmra.mxu3 %v733_v60  ;;  %v855_v2 = vld [vmem:[%s2348_s2 + $0x18] sm:$0xff] }
  0x8a   :  { %918 = vmatpush.bf16.msra.mxu3 %v1597_v3  ;;  %v863_v3 = vld [vmem:[%s2348_s2 + $0x58] sm:$0xff] }
  0x8b   :  { %877 = vmatpush.bf16.msra.mxu0 %v1604_v4  ;;  %v852_v4 = vld [vmem:[%s2348_s2] sm:$0xff] }
  0x8c   :  { %891 = vmatpush.bf16.msra.mxu1 %v1609_v5  ;;  %v860_v5 = vld [vmem:[%s2348_s2 + $0x40] sm:$0xff] }
  0x8d   :  { %905 = vmatpush.bf16.msra.mxu2 %v1616_v6  ;;  %v853_v6 = vld [vmem:[%s2348_s2 + $0x8] sm:$0xff] }
  0x8e   :  { %919 = vmatpush.bf16.msra.mxu3 %v1621_v7  ;;  %v861_v7 = vld [vmem:[%s2348_s2 + $0x48] sm:$0xff] }
  0x8f   :  { %878 = vmatpush.bf16.msra.mxu0 %v1628_v8  ;;  %v870_v8 = vpack.c.bf16 %v862_v1, %v854_v0 }
  0x90   :  { %892 = vmatpush.bf16.msra.mxu1 %v1633_v9  ;;  %v871_v9 = vpack.c.bf16 %v863_v3, %v855_v2 }
  0x91   :  { %906 = vmatpush.bf16.msra.mxu2 %v1640_v10  ;;  %v868_v10 = vpack.c.bf16 %v860_v5, %v852_v4 }
  0x92   :  { %920 = vmatpush.bf16.msra.mxu3 %v1645_v11  ;;  %v869_v11 = vpack.c.bf16 %v861_v7, %v853_v6  ;;  %v2245_v6 = vld [vmem:[%s2350_s4] ss:$0 sm:$0xff] }
  0x93   :  { %879 = vmatpush.bf16.msra.mxu0 %v1652_v12  ;;  %v1530_v12 = vmov 0.0  }
  0x94   :  { %893 = vmatpush.bf16.msra.mxu1 %v1657_v13  ;;  %47 = vst.msk [vmem:[#allocation2] sm:$0xff] %vm46_vm0, %v1530_v12  ;;  %v2403_v13 = vld [vmem:[#allocation8_spill] sm:$0xff] }
  0x95   :  { %907 = vmatpush.bf16.msra.mxu2 %v1664_v14  ;;  %48 = vst.msk [vmem:[#allocation2 + $0x8] sm:$0xff] %vm46_vm0, %v1530_v12  ;;  %v2404_v14 = vld [vmem:[#allocation9_spill] sm:$0xff] }
  0x96   :  { %921 = vmatpush.bf16.msra.mxu3 %v1669_v15  ;;  %49 = vst.msk [vmem:[#allocation3] sm:$0xff] %vm46_vm0, %v1530_v12  ;;  %v2405_v15 = vld [vmem:[#allocation10_spill] sm:$0xff] }
  0x97   :  { %880 = vmatpush.bf16.msra.mxu0 %v1676_v16  ;;  %50 = vst.msk [vmem:[#allocation3 + $0x8] sm:$0xff] %vm46_vm0, %v1530_v12  ;;  %v2406_v16 = vld [vmem:[#allocation11_spill] sm:$0xff] }
  0x98   :  { %894 = vmatpush.bf16.msra.mxu1 %v1681_v17  ;;  %51 = vst.msk [vmem:[#allocation4] sm:$0xff] %vm46_vm0, %v1530_v12 }
  0x99   :  { %908 = vmatpush.bf16.msra.mxu2 %v1688_v18  ;;  %52 = vst.msk [vmem:[#allocation4 + $0x8] sm:$0xff] %vm46_vm0, %v1530_v12 }
  0x9a   :  { %922 = vmatpush.bf16.msra.mxu3 %v1693_v19  ;;  %v2407_v19 = vld [vmem:[#allocation12_spill] sm:$0xff] }
  0x9b   :  { %881 = vmatpush.bf16.msra.mxu0 %v1700_v20  ;;  %v2408_v20 = vld [vmem:[#allocation13_spill] sm:$0xff] }
  0x9c   :  { %895 = vmatpush.bf16.msra.mxu1 %v1705_v21  ;;  %v2409_v21 = vld [vmem:[#allocation14_spill] sm:$0xff]  ;;  %v182_v4 = vld [vmem:[#allocation2 + $0x8] sm:$0xff] }
  0x9d   :  { %909 = vmatpush.bf16.msra.mxu2 %v1712_v22  ;;  %v2410_v22 = vld [vmem:[#allocation15_spill] sm:$0xff] }
  0x9e   :  { %923 = vmatpush.bf16.msra.mxu3 %v1717_v23 }
  0x9f   :  { %882 = vmatpush.bf16.msra.mxu0 %v1722_v24  ;;  %v856_v24 = vld [vmem:[%s2348_s2 + $0x20] sm:$0xff] }
  0xa0   :  { %896 = vmatpush.bf16.msra.mxu1 %v1729_v25  ;;  %v864_v25 = vld [vmem:[%s2348_s2 + $0x60] sm:$0xff] }
  0xa1   :  { %910 = vmatpush.bf16.msra.mxu2 %v1736_v26  ;;  %v2411_v26 = vld [vmem:[#allocation16_spill] sm:$0xff] }
  0xa2   :  { %924 = vmatpush.bf16.msra.mxu3 %v1741_v27  ;;  %v2412_v27 = vld [vmem:[#allocation17_spill] sm:$0xff] }
  0xa3   :  { %883 = vmatpush.bf16.msra.mxu0 %v1746_v28  ;;  %v600_v17 = vpop.f32.mrf.mxu0  ;;  %v857_v28 = vld [vmem:[%s2348_s2 + $0x28] sm:$0xff] }
  0xa4   :  { %897 = vmatpush.bf16.msra.mxu1 %v1751_v29  ;;  %v614_v18 = vpop.f32.mrf.mxu1  ;;  %v865_v29 = vld [vmem:[%s2348_s2 + $0x68] sm:$0xff] }
  0xa5   :  { %911 = vmatpush.bf16.msra.mxu2 %v1756_v30  ;;  %v858_v30 = vld [vmem:[%s2348_s2 + $0x30] sm:$0xff] }
  0xa6   :  { %925 = vmatpush.bf16.msra.mxu3 %v1761_v31  ;;  %884 = vmatmul.bf16.vlgmr.msra.gmra.mxu0 %v868_v10 }
  0xa7   :  { %932 = vmatpush.bf16.msrb.mxu0 %v1768_v32  ;;  %898 = vmatmul.bf16.vlgmr.msra.gmra.mxu1 %v869_v11  ;;  %v2413_v32 = vld [vmem:[#allocation18_spill] sm:$0xff] }
  0xa8   :  { %946 = vmatpush.bf16.msrb.mxu1 %v1773_v33  ;;  %912 = vmatmul.bf16.vlgmr.msra.gmra.mxu2 %v870_v8  ;;  %v2414_v33 = vld [vmem:[#allocation19_spill] sm:$0xff]  ;;  %v2250_v8 = vld [vmem:[%s2351_s5] ss:$0 sm:$0xff] }
  0xa9   :  { %960 = vmatpush.bf16.msrb.mxu2 %v1804_v42  ;;  %926 = vmatmul.bf16.vlgmr.msra.gmra.mxu3 %v871_v9  ;;  %v866_v42 = vld [vmem:[%s2348_s2 + $0x70] sm:$0xff] }
  0xaa   :  { %974 = vmatpush.bf16.msrb.mxu3 %v1809_v43  ;;  %v859_v43 = vld [vmem:[%s2348_s2 + $0x38] sm:$0xff] }
  0xab   :  { %933 = vmatpush.bf16.msrb.mxu0 %v1820_v48  ;;  %v628_v23 = vpop.f32.mrf.mxu2  ;;  %v867_v48 = vld [vmem:[%s2348_s2 + $0x78] sm:$0xff] }
  0xac   :  { %947 = vmatpush.bf16.msrb.mxu1 %v1825_v49  ;;  %v642_v31 = vpop.f32.mrf.mxu3  ;;  %v615_v49 = vadd.f32 %v614_v18, %v600_v17 }
  0xad   :  { %961 = vmatpush.bf16.msrb.mxu2 %v1832_v50  ;;  %v872_v50 = vpack.c.bf16 %v864_v25, %v856_v24 }
  0xae   :  { %975 = vmatpush.bf16.msrb.mxu3 %v1837_v51  ;;  %v873_v51 = vpack.c.bf16 %v865_v29, %v857_v28 }
  0xaf   :  { %934 = vmatpush.bf16.msrb.mxu0 %v1844_v52  ;;  %v602_v52 = vpop.f32.mrf.mxu0 }
  0xb0   :  { %948 = vmatpush.bf16.msrb.mxu1 %v1849_v53  ;;  %v874_v53 = vpack.c.bf16 %v866_v42, %v858_v30 }
  0xb1   :  { %962 = vmatpush.bf16.msrb.mxu2 %v1856_v54  ;;  %v875_v54 = vpack.c.bf16 %v867_v48, %v859_v43 }
  0xb2   :  { %976 = vmatpush.bf16.msrb.mxu3 %v1861_v55  ;;  %v616_v55 = vpop.f32.mrf.mxu1 }
  0xb3   :  { %935 = vmatpush.bf16.msrb.mxu0 %v1868_v56  ;;  %v629_v56 = vadd.f32 %v628_v23, %v615_v49  ;;  %v617_v60 = vadd.f32 %v616_v55, %v602_v52 }
  0xb4   :  { %949 = vmatpush.bf16.msrb.mxu1 %v1873_v57  ;;  %v630_v57 = vpop.f32.mrf.mxu2 }
  0xb5   :  { %963 = vmatpush.bf16.msrb.mxu2 %v1880_v58  ;;  %v643_v58 = vadd.f32 %v642_v31, %v629_v56 }
  0xb6   :  { %977 = vmatpush.bf16.msrb.mxu3 %v1885_v59  ;;  %v644_v59 = vpop.f32.mrf.mxu3 }
  0xb7   :  { %936 = vmatpush.bf16.msrb.mxu0 %v2403_v13 }
  0xb8   :  { %950 = vmatpush.bf16.msrb.mxu1 %v2404_v14 }
  0xb9   :  { %964 = vmatpush.bf16.msrb.mxu2 %v2405_v15 }
  0xba   :  { %978 = vmatpush.bf16.msrb.mxu3 %v2406_v16 }
  0xbb   :  { %937 = vmatpush.bf16.msrb.mxu0 %v2407_v19 }
  0xbc   :  { %951 = vmatpush.bf16.msrb.mxu1 %v2408_v20 }
  0xbd   :  { %965 = vmatpush.bf16.msrb.mxu2 %v2409_v21 }
  0xbe   :  { %979 = vmatpush.bf16.msrb.mxu3 %v2410_v22 }
  0xbf   :  { %938 = vmatpush.bf16.msrb.mxu0 %v2411_v26 }
  0xc0   :  { %952 = vmatpush.bf16.msrb.mxu1 %v2412_v27 }
  0xc1   :  { %966 = vmatpush.bf16.msrb.mxu2 %v2413_v32 }
  0xc2   :  { %980 = vmatpush.bf16.msrb.mxu3 %v2414_v33 }
  0xc3   :  { %939 = vmatpush.bf16.msrb.mxu0 %v1962_v44  ;;  %v656_v61 = vpop.f32.mrf.mxu0 }
  0xc4   :  { %953 = vmatpush.bf16.msrb.mxu1 %v1967_v45  ;;  %v657_v44 = vadd.f32 %v656_v61, %v643_v58  ;;  %v670_v62 = vpop.f32.mrf.mxu1  ;;  %v631_v45 = vadd.f32 %v630_v57, %v617_v60  ;;  %v709_v60 = vld [vmem:[#allocation3 + $0x8] sm:$0xff] }
  0xc5   :  { %967 = vmatpush.bf16.msrb.mxu2 %v1972_v46 }
  0xc6   :  { %981 = vmatpush.bf16.msrb.mxu3 %v1979_v47  ;;  %940 = vmatmul.bf16.vlgmr.msrb.gmra.mxu0 %v872_v50  ;;  %v671_v63 = vadd.f32 %v670_v62, %v657_v44  ;;  %v645_v35 = vadd.f32 %v644_v59, %v631_v45  ;;  %v181_v47 = vld [vmem:[#allocation2] sm:$0xff] }
  0xc7   :  { %954 = vmatmul.bf16.vlgmr.msrb.gmra.mxu1 %v873_v51  ;;  %v708_v51 = vld [vmem:[#allocation3] sm:$0xff] }
  0xc8   :  { %968 = vmatmul.bf16.vlgmr.msrb.gmra.mxu2 %v874_v53 }
  0xc9   :  { %982 = vmatmul.bf16.vlgmr.msrb.gmra.mxu3 %v875_v54 }
  0xcb   :  { %v684_v34 = vpop.f32.mrf.mxu2  ;;  %v658_v37 = vpop.f32.mrf.mxu0 }
  0xcc   :  { %v685_v36 = vadd.f32 %v684_v34, %v671_v63  ;;  %v698_v46 = vpop.f32.mrf.mxu3  ;;  %v659_v38 = vadd.f32 %v658_v37, %v645_v35  ;;  %v672_v40 = vpop.f32.mrf.mxu1 }
  0xce   :  { %v699_v39 = vadd.f32 %v698_v46, %v685_v36  ;;  %v673_v0 = vadd.f32 %v672_v40, %v659_v38 }
  0xd0   :  { %v703_v41 = vadd.f32 %v699_v39, %v181_v47 }
  0xd2   :  { %706 = vst.msk [vmem:[#allocation2] sm:$0xff] %vm46_vm0, %v703_v41  ;;  %v1494_v41 = vld [vmem:[%s2352_s6] ss:$0 sm:$0xff]  ;;  %s1083_s6 = sld [smem:[#allocation5]] }
  0xd3   :  { %v686_v1 = vpop.f32.mrf.mxu2 }
  0xd4   :  { %v687_v2 = vadd.f32 %v686_v1, %v673_v0  ;;  %v700_v3 = vpop.f32.mrf.mxu3 }
  0xd6   :  { %v701_v5 = vadd.f32 %v700_v3, %v687_v2 }
  0xd8   :  { %v704_v7 = vadd.f32 %v701_v5, %v182_v4 }
  0xd9   :  { %v996_v9 = vld [vmem:[#allocation2] sm:$0xff] }
  0xda   :  { %707 = vst.msk [vmem:[#allocation2 + $0x8] sm:$0xff] %vm46_vm0, %v704_v7  ;;  %v1001_v10 = vadd.f32 %v2245_v6, %v996_v9 }
  0xdc   :  { %v1093_v11 = vmul.f32 %v2250_v8, %v1001_v10 }
  0xde   :  { %v1095_v12 = vsel %vm46_vm0, %v1093_v11, 0.0 }
  0xdf   :  { %1096 = vadd.xlane.f32.xlu2 %v1095_v12 }
  0xe1   :  { %v997_v13 = vld [vmem:[#allocation2 + $0x8] sm:$0xff] }
  0xe2   :  { %v1002_v14 = vadd.f32 %v2245_v6, %v997_v13 }
  0xe3   :  { %v743_v17 = vpop.f32.mrf.mxu0 }
  0xe4   :  { %v1094_v15 = vmul.f32 %v2250_v8, %v1002_v14  ;;  %v757_v18 = vpop.f32.mrf.mxu1 }
  0xe5   :  { %v758_v21 = vadd.f32 %v757_v18, %v743_v17 }
  0xe6   :  { %v1098_v16 = vsel %vm46_vm0, %v1094_v15, 0.0 }
  0xe7   :  { %1099 = vadd.xlane.f32.xlu2 %v1098_v16 }
  0xeb   :  { %v771_v19 = vpop.f32.mrf.mxu2  ;;  %v745_v22 = vpop.f32.mrf.mxu0 }
  0xec   :  { %v785_v20 = vpop.f32.mrf.mxu3  ;;  %v759_v23 = vpop.f32.mrf.mxu1  ;;  %v772_v24 = vadd.f32 %v771_v19, %v758_v21 }
  0xed   :  { %v760_v28 = vadd.f32 %v759_v23, %v745_v22 }
  0xee   :  { %v786_v26 = vadd.f32 %v785_v20, %v772_v24 }
  0xf3   :  { %v773_v25 = vpop.f32.mrf.mxu2 }
  0xf4   :  { %v787_v27 = vpop.f32.mrf.mxu3  ;;  %v774_v32 = vadd.f32 %v773_v25, %v760_v28 }
  0xf6   :  { %v788_v43 = vadd.f32 %v787_v27, %v774_v32 }
 0x103   :  { %v799_v29 = vpop.f32.mrf.mxu0 }
 0x104   :  { %v800_v30 = vadd.f32 %v799_v29, %v786_v26  ;;  %v813_v31 = vpop.f32.mrf.mxu1  ;;  %v850_v26 = vld [vmem:[#allocation4] sm:$0xff] }
 0x106   :  { %v814_v33 = vadd.f32 %v813_v31, %v800_v30 }
 0x10b   :  { %v827_v42 = vpop.f32.mrf.mxu2  ;;  %v801_v50 = vpop.f32.mrf.mxu0 }
 0x10c   :  { %v828_v48 = vadd.f32 %v827_v42, %v814_v33  ;;  %v841_v49 = vpop.f32.mrf.mxu3  ;;  %v802_v52 = vadd.f32 %v801_v50, %v788_v43  ;;  %v815_v54 = vpop.f32.mrf.mxu1  ;;  %v851_v42 = vld [vmem:[#allocation4 + $0x8] sm:$0xff] }
 0x10e   :  { %v842_v53 = vadd.f32 %v841_v49, %v828_v48  ;;  %v816_v56 = vadd.f32 %v815_v54, %v802_v52 }
 0x110   :  { %v846_v55 = vadd.f32 %v842_v53, %v708_v51 }
 0x112   :  { %848 = vst.msk [vmem:[#allocation3] sm:$0xff] %vm46_vm0, %v846_v55 }
 0x113   :  { %v829_v57 = vpop.f32.mrf.mxu2 }
 0x114   :  { %v830_v58 = vadd.f32 %v829_v57, %v816_v56  ;;  %v843_v59 = vpop.f32.mrf.mxu3 }
 0x116   :  { %v844_v61 = vadd.f32 %v843_v59, %v830_v58 }
 0x118   :  { %v847_v44 = vadd.f32 %v844_v61, %v709_v60 }
 0x119   :  { %v1003_v62 = vld [vmem:[#allocation3] sm:$0xff] }
 0x11a   :  { %849 = vst.msk [vmem:[#allocation3 + $0x8] sm:$0xff] %vm46_vm0, %v847_v44  ;;  %v1005_v45 = vadd.f32 %v2245_v6, %v1003_v62 }
 0x11c   :  { %v1011_v63 = vsub.f32 %v1001_v10, %v1005_v45  ;;  %v1112_v1 = vmul.f32 %v1494_v41, %v1005_v45 }
 0x11e   :  { %v1013_v34 = vadd.f32 1e-06, %v1011_v63  ;;  %v1114_v3 = vsel %vm46_vm0, %v1112_v1, 0.0 }
 0x120   :  { %v1015_v35 = vmul.f32 %v1013_v34, %v1013_v34 }
 0x121   :  { %v1004_v36 = vld [vmem:[#allocation3 + $0x8] sm:$0xff] }
 0x122   :  { %v1017_v46 = vsel %vm46_vm0, %v1015_v35, 0.0  ;;  %v2264_v37 = vadd.f32 %v2245_v6, %v1004_v36 }
 0x123   :  { %1018 = vadd.xlane.f32.xlu0 %v1017_v46  ;;  %v885_v0 = vpop.f32.mrf.mxu0 }
 0x124   :  { %v1012_v47 = vsub.f32 %v1002_v14, %v2264_v37  ;;  %v899_v2 = vpop.f32.mrf.mxu1  ;;  %v1113_v34 = vmul.f32 %v1494_v41, %v2264_v37 }
 0x125   :  { %v900_v7 = vadd.f32 %v899_v2, %v885_v0 }
 0x126   :  { %v1014_v38 = vadd.f32 1e-06, %v1012_v47  ;;  %v1117_v35 = vsel %vm46_vm0, %v1113_v34, 0.0 }
 0x128   :  { %v1016_v39 = vmul.f32 %v1014_v38, %v1014_v38 }
 0x12a   :  { %v1020_v40 = vsel %vm46_vm0, %v1016_v39, 0.0 }
 0x12b   :  { %1021 = vadd.xlane.f32.xlu0 %v1020_v40  ;;  %v913_v4 = vpop.f32.mrf.mxu2  ;;  %v887_v9 = vpop.f32.mrf.mxu0 }
 0x12c   :  { %v927_v5 = vpop.f32.mrf.mxu3  ;;  %v901_v10 = vpop.f32.mrf.mxu1  ;;  %v914_v11 = vadd.f32 %v913_v4, %v900_v7 }
 0x12d   :  { %v902_v15 = vadd.f32 %v901_v10, %v887_v9 }
 0x12e   :  { %v928_v14 = vadd.f32 %v927_v5, %v914_v11  ;;  %v1120_v5 = vstv %s2292_s20 }
 0x133   :  { %1115 = vadd.xlane.f32.xlu0 %v1114_v3  ;;  %v915_v12 = vpop.f32.mrf.mxu2 }
 0x134   :  { %v929_v13 = vpop.f32.mrf.mxu3  ;;  %v916_v19 = vadd.f32 %v915_v12, %v902_v15 }
 0x136   :  { %v930_v23 = vadd.f32 %v929_v13, %v916_v19 }
 0x143   :  { %v941_v16 = vpop.f32.mrf.mxu0 }
 0x144   :  { %v942_v17 = vadd.f32 %v941_v16, %v928_v14  ;;  %v955_v18 = vpop.f32.mrf.mxu1 }
 0x146   :  { %v956_v20 = vadd.f32 %v955_v18, %v942_v17 }
 0x14b   :  { %v969_v21 = vpop.f32.mrf.mxu2  ;;  %v943_v25 = vpop.f32.mrf.mxu0 }
 0x14c   :  { %v983_v22 = vpop.f32.mrf.mxu3  ;;  %v970_v24 = vadd.f32 %v969_v21, %v956_v20  ;;  %v944_v28 = vadd.f32 %v943_v25, %v930_v23  ;;  %v957_v30 = vpop.f32.mrf.mxu1  ;;  %v1106_v21 = vstv %s2295_s21 }
 0x14e   :  { %v984_v27 = vadd.f32 %v983_v22, %v970_v24  ;;  %v958_v31 = vadd.f32 %v957_v30, %v944_v28 }
 0x150   :  { %v988_v29 = vadd.f32 %v984_v27, %v850_v26 }
 0x152   :  { %990 = vst.msk [vmem:[#allocation4] sm:$0xff] %vm46_vm0, %v988_v29  ;;  %v1097_v46 = vpop.xlane.xlu2 %1096 }
 0x153   :  { %v971_v32 = vpop.f32.mrf.mxu2 }
 0x154   :  { %v972_v33 = vadd.f32 %v971_v32, %v958_v31  ;;  %v985_v43 = vpop.f32.mrf.mxu3 }
 0x156   :  { %v986_v48 = vadd.f32 %v985_v43, %v972_v33  ;;  %v1140_v43 = vstv %s2302_s22 }
 0x158   :  { %v989_v49 = vadd.f32 %v986_v48, %v851_v42  ;;  %v1125_v42 = vstv %s2298_s3 }
 0x159   :  { %v1007_v50 = vld [vmem:[#allocation4] sm:$0xff] }
 0x15a   :  { %991 = vst.msk [vmem:[#allocation4 + $0x8] sm:$0xff] %vm46_vm0, %v989_v49  ;;  %v1009_v51 = vadd.f32 %v2245_v6, %v1007_v50  ;;  %v1100_v40 = vpop.xlane.xlu2 %1099 }
 0x15c   :  { %v1128_v52 = vmul.f32 %v2250_v8, %v1009_v51  ;;  %v1047_v53 = vsub.f32 %v1005_v45, %v1009_v51 }
 0x15e   :  { %v1130_v54 = vsel %vm46_vm0, %v1128_v52, 0.0  ;;  %v1049_v55 = vadd.f32 1e-06, %v1047_v53 }
 0x15f   :  { %1131 = vadd.xlane.f32.xlu2 %v1130_v54 }
 0x160   :  { %v1051_v56 = vmul.f32 %v1049_v55, %v1049_v55 }
 0x161   :  { %v1008_v57 = vld [vmem:[#allocation4 + $0x8] sm:$0xff] }
 0x162   :  { %v1053_v58 = vsel %vm46_vm0, %v1051_v56, 0.0  ;;  %v1010_v59 = vadd.f32 %v2245_v6, %v1008_v57 }
 0x163   :  { %1054 = vadd.xlane.f32.xlu1 %v1053_v58 }
 0x164   :  { %v1129_v60 = vmul.f32 %v2250_v8, %v1010_v59  ;;  %v1048_v61 = vsub.f32 %v2264_v37, %v1010_v59  ;;  %v1101_v37 = vstv %s1083_s6 }
 0x165   :  { %v1102_v2 = vadd.f32 %v1101_v37, %v1097_v46  ;;  %v1103_v22 = vadd.f32 %v1101_v37, %v1100_v40 }
 0x166   :  { %v1133_v44 = vsel %vm46_vm0, %v1129_v60, 0.0  ;;  %v1050_v62 = vadd.f32 1e-06, %v1048_v61 }
 0x167   :  { %1134 = vadd.xlane.f32.xlu0 %v1133_v44 }
 0x168   :  { %v1052_v45 = vmul.f32 %v1050_v62, %v1050_v62 }
 0x16a   :  { %v1056_v63 = vsel %vm46_vm0, %v1052_v45, 0.0 }
 0x16b   :  { %1057 = vadd.xlane.f32.xlu1 %v1056_v63 }
 0x173   :  { %1118 = vadd.xlane.f32.xlu1 %v1117_v35 }
 0x196   :  { %v2285_v36 = vpop.xlane.xlu0 %1018 }
 0x197   :  { %1495 = vrsqrt.f32 %v2285_v36  ;;  %vm1030_vm1 = vcmp.eq.f32.partialorder %v2285_v36, inf  ;;  %v1033_v30 = vand.u32 2147483648, %v2285_v36  ;;  %vm1032_vm2 = vcmp.eq.f32.partialorder %v2285_v36, 0.0 }
 0x19d   :  { %v1496_v8 = vpop.eup %1495 }
 0x19e   :  { %v2288_v6 = vpop.xlane.xlu0 %1021  ;;  %v1024_v47 = vmul.f32 %v1496_v8, %v2285_v36 }
 0x19f   :  { %1497 = vrsqrt.f32 %v2288_v6  ;;  %vm1042_vm11 = vcmp.eq.f32.partialorder %v2288_v6, inf  ;;  %vm1044_vm13 = vcmp.eq.f32.partialorder %v2288_v6, 0.0 }
 0x1a0   :  { %v1025_v38 = vmul.f32 %v1496_v8, %v1024_v47 }
 0x1a2   :  { %v1026_v41 = vmul.f32 0.5, %v1025_v38 }
 0x1a4   :  { %v1027_v3 = vsub.f32 1.5, %v1026_v41 }
 0x1a5   :  { %v1498_v39 = vpop.eup %1497 }
 0x1a6   :  { %v1036_v0 = vmul.f32 %v1498_v39, %v2288_v6  ;;  %v1116_v7 = vpop.xlane.xlu0 %1115  ;;  %v1028_v10 = vmul.f32 %v1496_v8, %v1027_v3 }
 0x1a7   :  { %v1121_v13 = vadd.f32 %v1120_v5, %v1116_v7 }
 0x1a8   :  { %v1037_v4 = vmul.f32 %v1498_v39, %v1036_v0  ;;  %v1029_v18 = vmul.f32 %v1028_v10, %v2285_v36 }
 0x1aa   :  { %v1038_v11 = vmul.f32 0.5, %v1037_v4  ;;  %v1031_v27 = vsel %vm1030_vm1, %v2285_v36, %v1029_v18 }
 0x1ab   :  { %v1034_v50 = vsel %vm1032_vm2, %v1033_v30, %v1031_v27 }
 0x1ac   :  { %v1039_v19 = vsub.f32 1.5, %v1038_v11 }
 0x1ae   :  { %v1040_v28 = vmul.f32 %v1498_v39, %v1039_v19  ;;  %v1045_v39 = vand.u32 2147483648, %v2288_v6 }
 0x1b0   :  { %v1041_v54 = vmul.f32 %v1040_v28, %v2288_v6 }
 0x1b2   :  { %v1043_v8 = vsel %vm1042_vm11, %v2288_v6, %v1041_v54 }
 0x1d2   :  { %v1132_v12 = vpop.xlane.xlu2 %1131 }
 0x1d3   :  { %v1136_v16 = vadd.f32 %v1132_v12, %v1101_v37 }
 0x1d6   :  { %v1055_v1 = vpop.xlane.xlu1 %1054 }
 0x1d7   :  { %1499 = vrsqrt.f32 %v1055_v1  ;;  %vm1066_vm3 = vcmp.eq.f32.partialorder %v1055_v1, inf  ;;  %v1069_v55 = vand.u32 2147483648, %v1055_v1  ;;  %vm1068_vm5 = vcmp.eq.f32.partialorder %v1055_v1, 0.0 }
 0x1d8   :  { %1501 = vtanh.f32 %v1102_v2 }
 0x1da   :  { %v1135_v29 = vpop.xlane.xlu0 %1134 }
 0x1db   :  { %v1137_v52 = vadd.f32 %v1135_v29, %v1101_v37 }
 0x1dd   :  { %v1500_v9 = vpop.eup %1499 }
 0x1de   :  { %v1060_v14 = vmul.f32 %v1500_v9, %v1055_v1  ;;  %v2300_v15 = vpop.xlane.xlu1 %1057  ;;  %v1502_v20 = vpop.eup %1501 }
 0x1df   :  { %1503 = vrsqrt.f32 %v2300_v15  ;;  %v1107_v26 = vmul.f32 %v1502_v20, %v1106_v21  ;;  %vm1078_vm12 = vcmp.eq.f32.partialorder %v2300_v15, inf  ;;  %v1081_v37 = vand.u32 2147483648, %v2300_v15 }
 0x1e0   :  { %v1061_v17 = vmul.f32 %v1500_v9, %v1060_v14  ;;  %1505 = vtanh.f32 %v1121_v13  ;;  %vm1080_vm14 = vcmp.eq.f32.partialorder %v2300_v15, 0.0 }
 0x1e1   :  { %1507 = vtanh.f32 %v1136_v16 }
 0x1e2   :  { %v1062_v23 = vmul.f32 0.5, %v1061_v17  ;;  %1509 = vtanh.f32 %v1103_v22 }
 0x1e4   :  { %v1063_v24 = vsub.f32 1.5, %v1062_v23 }
 0x1e5   :  { %v1504_v25 = vpop.eup %1503 }
 0x1e6   :  { %v1064_v31 = vmul.f32 %v1500_v9, %v1063_v24  ;;  %v1072_v32 = vmul.f32 %v1504_v25, %v2300_v15  ;;  %v1119_v33 = vpop.xlane.xlu1 %1118  ;;  %v1506_v49 = vpop.eup %1505 }
 0x1e7   :  { %v1122_v48 = vadd.f32 %v1120_v5, %v1119_v33  ;;  %v1508_v56 = vpop.eup %1507  ;;  %v1126_v59 = vmul.f32 %v1506_v49, %v1125_v42 }
 0x1e8   :  { %v1065_v51 = vmul.f32 %v1064_v31, %v1055_v1  ;;  %v1073_v53 = vmul.f32 %v1504_v25, %v1072_v32  ;;  %v1510_v61 = vpop.eup %1509  ;;  %v1141_v45 = vmul.f32 %v1508_v56, %v1140_v43 }
 0x1e9   :  { %1511 = vtanh.f32 %v1122_v48  ;;  %v1108_v0 = vmul.f32 %v1510_v61, %v1106_v21 }
 0x1ea   :  { %v1067_v57 = vsel %vm1066_vm3, %v1055_v1, %v1065_v51  ;;  %v1074_v58 = vmul.f32 0.5, %v1073_v53  ;;  %1513 = vtanh.f32 %v1137_v52  ;;  %v1046_v1 = vsel %vm1044_vm13, %v1045_v39, %v1043_v8 }
 0x1eb   :  { %v1070_v60 = vsel %vm1068_vm5, %v1069_v55, %v1067_v57 }
 0x1ec   :  { %v1075_v44 = vsub.f32 1.5, %v1074_v58  ;;  %v1144_v62 = vsel %vm1143_vm4, %v1034_v50, %v1070_v60 }
 0x1ed   :  { %v1147_v63 = vsel %vm1146_vm6, %v1144_v62, %v1107_v26 }
 0x1ee   :  { %v1076_v34 = vmul.f32 %v1504_v25, %v1075_v44  ;;  %v1150_v35 = vsel %vm1149_vm7, %v1147_v63, %v1126_v59 }
 0x1ef   :  { %v1153_v36 = vsel %vm1152_vm8, %v1150_v35, %v1141_v45  ;;  %v1512_v38 = vpop.eup %1511 }
 0x1f0   :  { %v1077_v46 = vmul.f32 %v1076_v34, %v2300_v15  ;;  %v1156_v47 = vsel %vm1155_vm9, %v1153_v36, 0.0  ;;  %v1514_v40 = vpop.eup %1513  ;;  %v1127_v3 = vmul.f32 %v1512_v38, %v1125_v42 }
 0x1f1   :  { %1159 = vst.msk [vmem:[%s2354_s8] sm:$0xff] %vm1158_vm10, %v1156_v47  ;;  %v1142_v5 = vmul.f32 %v1514_v40, %v1140_v43 }
 0x1f2   :  { %v1079_v41 = vsel %vm1078_vm12, %v2300_v15, %v1077_v46 }
 0x1f3   :  { %v1082_v2 = vsel %vm1080_vm14, %v1081_v37, %v1079_v41 }
 0x1f4   :  { %v1145_v4 = vsel %vm1143_vm4, %v1046_v1, %v1082_v2 }
 0x1f5   :  { %v1148_v7 = vsel %vm1146_vm6, %v1145_v4, %v1108_v0 }
 0x1f6   :  { %v1151_v9 = vsel %vm1149_vm7, %v1148_v7, %v1127_v3 }
 0x1f7   :  { %v1154_v10 = vsel %vm1152_vm8, %v1151_v9, %v1142_v5 }
 0x1f8   :  { %v1157_v6 = vsel %vm1155_vm9, %v1154_v10, 0.0 }
 0x1f9   :  { %1160 = vst.msk [vmem:[%s2354_s8 + $0x8] sm:$0xff] %vm1158_vm10, %v1157_v6 }
 0x1fa   :  { %1165 = vsyncpa [#allocation6], 1 }

</bundles_post_ra>
